<compile_context>
chip_gen: v5e
topology: v5e:2x2
jax: 0.10.0
libtpu: 0.0.40
codegen_flags: <defaults>
</compile_context>

<pallas_src>
import functools

import jax
import jax.numpy as jnp
from jax.experimental import pallas as pl
from jax.experimental.pallas import tpu as pltpu

_LANE_CHOICES = (1024, 512, 256, 128)   # lane-dense last-dim candidates
_MAX_BLOCK_ELEMS = 256 * 1024           # ~1 MiB per f32 stream per block


# ---------------------------------------------------------------------------
# Kernel: fused noise shift/abs/clamp + flooding where + dtype cast.
# ---------------------------------------------------------------------------
def _flood_kernel(nmin_ref, x_ref, z_ref, o_ref, *, noise_std):
    nmin = nmin_ref[0]                                   # f32 scalar from SMEM
    x = x_ref[...].astype(jnp.float32)
    noise = jnp.abs(nmin + jnp.float32(noise_std) * z_ref[...])   # Normal(nmin, std), abs
    noise = jnp.maximum(noise, nmin)                     # torch.clamp(min=noise_min)
    o_ref[...] = jnp.where(x < noise, noise, x).astype(o_ref.dtype)


# ---------------------------------------------------------------------------
# Wrapper
# ---------------------------------------------------------------------------
def flood_signal(signal, noise_level, noise_std=0.3, key=None):
    if key is None:
        key = jax.random.PRNGKey(0)

    orig_shape = signal.shape
    orig_dtype = signal.dtype
    n = int(signal.size)

    # Global min via XLA reduce (near-roofline, uses both TCs on v7x).
    noise_min = jnp.min(signal).astype(jnp.float32) + jnp.float32(noise_level)
    nmin_arr = noise_min.reshape(1)

    # Lane-dense 2-D layout for the elementwise pass.
    lane = next((l for l in _LANE_CHOICES if n % l == 0), None)
    if lane is None:                      # ragged fallback: pad to a lane multiple
        lane = 512
        padded_n = pl.cdiv(n, lane) * lane
    else:                                 # common case: free reshape, no pad/slice
        padded_n = n
    rows = padded_n // lane

    flat = signal.reshape(-1)
    if padded_n != n:
        flat = jnp.pad(flat, (0, padded_n - n))
    x2d = flat.reshape(rows, lane)

    # Standard-normal draw consumed inside the kernel (mean/std applied in-kernel).
    z2d = jax.random.normal(key, (rows, lane), dtype=jnp.float32)

    # Block rows: biggest tile <= ~1 MiB f32 per stream. Full-dim when the slab is
    # small (always legal); otherwise a multiple of 8 (partial last block is masked).
    br = min(rows, max(8, _MAX_BLOCK_ELEMS // lane))
    grid = (pl.cdiv(rows, br),)

    out2d = pl.pallas_call(
        functools.partial(_flood_kernel, noise_std=float(noise_std)),
        out_shape=jax.ShapeDtypeStruct((rows, lane), orig_dtype),
        grid=grid,
        in_specs=[
            pl.BlockSpec(memory_space=pltpu.MemorySpace.SMEM),   # noise_min (1,) f32
            pl.BlockSpec((br, lane), lambda i: (i, 0)),          # signal tile (orig dtype)
            pl.BlockSpec((br, lane), lambda i: (i, 0)),          # z tile (f32)
        ],
        out_specs=pl.BlockSpec((br, lane), lambda i: (i, 0)),
        compiler_params=pltpu.CompilerParams(
            dimension_semantics=("parallel",)),
    )(nmin_arr, x2d, z2d)

    out = out2d.reshape(-1)
    if padded_n != n:
        out = out[:n]
    return out.reshape(orig_shape)


if __name__ == "__main__":
    key = jax.random.PRNGKey(0)
    data_key, noise_key = jax.random.split(key)

    # Small NCHW signal, consistent with a conv-style feature map.
    x = jax.random.normal(data_key, (2, 4, 16, 16), dtype=jnp.float32)

    noise_level = 0.5
    noise_std = 0.3

    out = flood_signal(x, noise_level, noise_std, key=noise_key)
    out = jax.block_until_ready(out)

    # Sanity: shape/dtype preserved; flooding never lowers the signal; everything
    # ends up at or above the noise floor.
    nmin = jnp.min(x) + noise_level
    assert out.shape == x.shape and out.dtype == x.dtype
    assert bool(jnp.all(out >= x))
    assert bool(jnp.all(out >= nmin))

    print("KERNEL_OK")
</pallas_src>

<mosaic_0001>
module attributes {stable_mosaic.version = 11 : i64} {
  func.func @_flood_kernel(%arg0: i32, %arg1: memref<1xf32, #tpu.memory_space<smem>>, %arg2: memref<2x1024xf32, #tpu.memory_space<vmem>>, %arg3: memref<2x1024xf32, #tpu.memory_space<vmem>>, %arg4: memref<2x1024xf32, #tpu.memory_space<vmem>>) attributes {dimension_semantics = [#tpu.dimension_semantics<parallel>], iteration_bounds = array<i64: 1>, scalar_prefetch = 0 : i64, scratch_operands = 0 : i64, tpu.core_type = #tpu.core_type<tc>, window_params = [{transform_indices = @transform_0, window_bounds = array<i64: 1>}, {transform_indices = @transform_1, window_bounds = array<i64: 2, 1024>}, {transform_indices = @transform_2, window_bounds = array<i64: 2, 1024>}, {transform_indices = @transform_3, window_bounds = array<i64: 2, 1024>}]} {
    %c0 = arith.constant 0 : index
    %0 = memref.load %arg1[%c0] : memref<1xf32, #tpu.memory_space<smem>>
    %c0_0 = arith.constant 0 : index
    %c0_1 = arith.constant 0 : index
    %1 = vector.load %arg2[%c0_0, %c0_1] : memref<2x1024xf32, #tpu.memory_space<vmem>>, vector<2x1024xf32>
    %c0_2 = arith.constant 0 : index
    %c0_3 = arith.constant 0 : index
    %2 = vector.load %arg3[%c0_2, %c0_3] : memref<2x1024xf32, #tpu.memory_space<vmem>>, vector<2x1024xf32>
    %cst = arith.constant 3.000000e-01 : f32
    %3 = vector.broadcast %cst : f32 to vector<2x1024xf32>
    %4 = arith.mulf %3, %2 : vector<2x1024xf32>
    %5 = vector.broadcast %0 : f32 to vector<2x1024xf32>
    %6 = arith.addf %5, %4 : vector<2x1024xf32>
    %7 = math.absf %6 : vector<2x1024xf32>
    %8 = vector.broadcast %0 : f32 to vector<2x1024xf32>
    %9 = arith.maximumf %7, %8 : vector<2x1024xf32>
    %10 = arith.cmpf olt, %1, %9 : vector<2x1024xf32>
    %11 = arith.select %10, %9, %1 : vector<2x1024xi1>, vector<2x1024xf32>
    %c0_4 = arith.constant 0 : index
    %c0_5 = arith.constant 0 : index
    %12 = vector.load %arg4[%c0_4, %c0_5] : memref<2x1024xf32, #tpu.memory_space<vmem>>, vector<2x1024xf32>
    tpu.vector_store %arg4[%c0_4, %c0_5], %11 {strides = array<i32>} : memref<2x1024xf32, #tpu.memory_space<vmem>>, vector<2x1024xf32>,
    return
  }
  func.func @transform_0(%arg0: i32) -> i32 {
    %c0_i32 = arith.constant 0 : i32
    %c0_i32_0 = arith.constant 0 : i32
    return %c0_i32 : i32
  }
  func.func @transform_1(%arg0: i32) -> (i32, i32) {
    %c0_i32 = arith.constant 0 : i32
    %c0_i32_0 = arith.constant 0 : i32
    return %arg0, %c0_i32 : i32, i32
  }
  func.func @transform_2(%arg0: i32) -> (i32, i32) {
    %c0_i32 = arith.constant 0 : i32
    %c0_i32_0 = arith.constant 0 : i32
    return %arg0, %c0_i32 : i32, i32
  }
  func.func @transform_3(%arg0: i32) -> (i32, i32) {
    %c0_i32 = arith.constant 0 : i32
    %c0_i32_0 = arith.constant 0 : i32
    return %arg0, %c0_i32 : i32, i32
  }
}

</mosaic_0001>

<bundles_post_ra>
// kernel: tpu_custom_call.1
= control target key start
LH: loop header
LB: loop body
LE: loop exit
PB: predicated region body
PF: predicated region fallthrough
CT: control target
= control target key end

     0   :  { %9 = vsyncpa [#allocation4], 0  ;;  %s198_s0 = inlined_call_operand.<no memory space> [shape: f32[1], index: 0, kind: input, shape index: {}]   ;;  %s199_s1 = inlined_call_operand.hbm [shape: f32[2,1024], index: 1, kind: input, shape index: {}]   ;;  %s200_s2 = inlined_call_operand.hbm [shape: f32[2,1024], index: 2, kind: input, shape index: {}]   ;;  %s201_s3 = inlined_call_operand.hbm [shape: f32[2,1024], index: 3, kind: output, shape index: {}]  }
   0x1   :  { %10 = vsyncpa [#allocation7], 0 }
   0x2   :  { %11 = vsyncpa [#allocation5], 0  ;;  %s19_s14 = sshll.u32 %s199_s1, 4  ;;  %s163_s15 = smov [#allocation3]   ;;  %s20_s14 = int_to_ptr.hbm [resolvable:$true] %s19_s14 }
   0x3   :  { %s21_s16 = sshll.u32 %s163_s15, 4  ;;  %s30_s19 = sshll.u32 %s200_s2, 4  ;;  %s22_s16 = int_to_ptr.vmem [resolvable:$true] %s21_s16  ;;  %s31_s19 = int_to_ptr.hbm [resolvable:$true] %s30_s19 }
   0x4   :  { %24 = dma.hbm_to_vmem [thread:$0]  %s20_s14, 256, %s22_s16, [#allocation4]  }
   0x5   :  { %s164_s20 = smov [#allocation6]  }
   0x6   :  { %s32_s21 = sshll.u32 %s164_s20, 4  ;;  %s33_s21 = int_to_ptr.vmem [resolvable:$true] %s32_s21 }
   0x7   :  { %35 = dma.hbm_to_vmem [thread:$0]  %s31_s19, 256, %s33_s21, [#allocation7]  }
   0x8   :  { %157 = dma.done.wait [#allocation4], 256  }
   0x9   :  { %158 = vsyncadd [#allocation4], 4294967040 }
   0xa   :  { %159 = dma.done.wait [#allocation7], 256  }
   0xb   :  { %160 = vsyncadd [#allocation7], 4294967040  ;;  %v47_v0 = vld [vmem:[#allocation6] sm:$0xff]  ;;  %v51_v1 = vstv %s198_s0  ;;  %v48_v3 = vld [vmem:[#allocation6 + $0x8] sm:$0xff]  ;;  %s165_s2 = smov [#allocation8]   ;;  %s71_s26 = sshll.u32 %s201_s3, 4  ;;  %s72_s26 = int_to_ptr.hbm [resolvable:$true] %s71_s26 }
   0xc   :  { %v49_v2 = vmul.f32 0.3, %v47_v0  ;;  %v50_v4 = vmul.f32 0.3, %v48_v3  ;;  %v45_v8 = vld [vmem:[#allocation3] sm:$0xff]  ;;  %v46_v11 = vld [vmem:[#allocation3 + $0x8] sm:$0xff] }
   0xd   :  { %s69_s23 = sshll.u32 %s165_s2, 4  ;;  %s70_s23 = int_to_ptr.vmem [resolvable:$true] %s69_s23 }
   0xe   :  { %v52_v5 = vadd.f32 %v51_v1, %v49_v2  ;;  %v53_v6 = vadd.f32 %v51_v1, %v50_v4 }
  0x10   :  { %v54_v7 = vand.u32 2147483647, %v52_v5  ;;  %v55_v9 = vand.u32 2147483647, %v53_v6 }
  0x12   :  { %v56_v10 = vmax.f32 %v54_v7, %v51_v1  ;;  %v57_v12 = vmax.f32 %v55_v9, %v51_v1 }
  0x14   :  { %vm58_vm0 = vcmp.lt.f32.partialorder %v45_v8, %v56_v10  ;;  %vm59_vm1 = vcmp.lt.f32.partialorder %v46_v11, %v57_v12 }
  0x15   :  { %v60_v13 = vsel %vm58_vm0, %v56_v10, %v45_v8  ;;  %v61_v14 = vsel %vm59_vm1, %v57_v12, %v46_v11 }
  0x16   :  { %62 = vst [vmem:[#allocation8] sm:$0xff] %v60_v13 }
  0x17   :  { %63 = vst [vmem:[#allocation8 + $0x8] sm:$0xff] %v61_v14 }
  0x18   :  { %74 = dma.vmem_to_hbm [thread:$0]  %s70_s23, 256, %s72_s26, [#allocation5]  }
  0x19   :  { %161 = dma.done.wait [#allocation5], 256  }
  0x1a   :  { %162 = vsyncadd [#allocation5], 4294967040 }
  0x1b   :  { %79 = vsyncpa [#allocation4], 1 }
  0x1c   :  { %80 = vsyncpa [#allocation7], 1 }
  0x1d   :  { %81 = vsyncpa [#allocation5], 1 }

</bundles_post_ra>
